<compile_context>
chip_gen: v6e
topology: v6e:2x2x1
jax: 0.10.0
libtpu: 0.0.40
codegen_flags: <defaults>
</compile_context>

<pallas_src>
import jax
import jax.numpy as jnp
from jax.experimental import pallas as pl
from jax.experimental.pallas import tpu as pltpu


def _make_mlp_kernel(n_hidden, eps=1e-5, matmul_dtype=jnp.float32):
    """Build a kernel closure for a fixed number of hidden blocks."""

    def kernel(*refs):
        # refs = (x, [W, gamma, beta] * n_hidden, W_out, b_out, out)
        x_ref = refs[0]
        o_ref = refs[-1]

        batch = x_ref.shape[0]
        inv_b = 1.0 / batch
        # Hoisted: reused by the MXU stats matmul in every layer.
        ones_bt = jnp.ones((1, batch), jnp.float32)

        h = x_ref[...]
        idx = 1
        for _ in range(n_hidden):
            w = refs[idx][...]           # (F_in, F_out), already matmul_dtype
            gamma = refs[idx + 1][...]   # (1, F_out) f32
            beta = refs[idx + 2][...]    # (1, F_out) f32
            idx += 3

            # Linear (MXU, f32 accumulate). Hidden bias omitted: training-mode
            # BN subtracts the batch mean right after, cancelling it exactly.
            h = jnp.dot(h.astype(matmul_dtype), w,
                        preferred_element_type=jnp.float32)

            # Batch statistics on the MXU: one-pass sum / sum-of-squares
            # (no axis-0 XLU reductions over the batch tile).
            s = jnp.dot(ones_bt, h, preferred_element_type=jnp.float32)
            sq = jnp.dot(ones_bt, h * h, preferred_element_type=jnp.float32)
            mean = s * inv_b
            var = jnp.maximum(sq * inv_b - mean * mean, 0.0)

            # BN folded into a single scale/shift ((1,F) math only), fused ReLU.
            scale = gamma * jax.lax.rsqrt(var + eps)
            shift = beta - mean * scale
            h = jnp.maximum(h * scale + shift, 0.0)

        w_out = refs[idx][...]
        b_out = refs[idx + 1][...]
        o_ref[...] = jnp.dot(h.astype(matmul_dtype), w_out,
                             preferred_element_type=jnp.float32) + b_out

    return kernel


def _round_up(n, m):
    return ((n + m - 1) // m) * m


def _pad2d(a, rows, cols):
    pr = rows - a.shape[0]
    pc = cols - a.shape[1]
    if pr == 0 and pc == 0:
        return a
    return jnp.pad(a, ((0, pr), (0, pc)))


def mlp_layer_forward(x, hidden_params, out_w, out_b, *,
                      matmul_dtype=jnp.bfloat16, lane_pad=True, eps=1e-5):
    """Run the MLPLayer forward pass in one fused Pallas kernel.

    x:              (B, input_size) float32
    hidden_params:  list of (W, b, gamma, beta) per hidden block; W is (in, out).
                    The linear bias `b` is intentionally NOT passed to the kernel:
                    training-mode BatchNorm cancels it exactly.
    out_w, out_b:   output linear params, (in, out) and (1, out).
    matmul_dtype:   operand dtype for the MXU matmuls (accumulation stays f32).
    lane_pad:       zero-pad feature dims to multiples of 128 (lane-dense
                    activations / unmasked output stores); exact (adds zeros).
    """
    n_hidden = len(hidden_params)
    batch = x.shape[0]
    out_dim = out_w.shape[1]

    def pad_cols(n):
        return _round_up(n, 128) if lane_pad else n

    flat_params = []
    prev_f = x.shape[1]                          # current (possibly padded) feature dim
    for (w, _b, gamma, beta) in hidden_params:   # _b dropped: cancelled by BN
        f_out = pad_cols(w.shape[1])
        flat_params.append(_pad2d(w, prev_f, f_out).astype(matmul_dtype))
        # Pad gamma/beta with 0 so padded lanes stay exactly 0 through BN/ReLU.
        flat_params.append(_pad2d(gamma, 1, f_out))
        flat_params.append(_pad2d(beta, 1, f_out))
        prev_f = f_out
    out_p = pad_cols(out_dim)
    flat_params.append(_pad2d(out_w, prev_f, out_p).astype(matmul_dtype))
    flat_params.append(_pad2d(out_b, 1, out_p))

    args = (x, *flat_params)

    # Explicit VMEM budget: parameters + I/O + a few live (B, F) activations.
    max_f = max([x.shape[1], out_p] + [p.shape[1] for p in flat_params])
    act_bytes = batch * max_f * 4
    io_bytes = sum(int(a.size) * a.dtype.itemsize for a in args) + batch * out_p * 4
    live_bytes = io_bytes + 4 * act_bytes
    if live_bytes > (48 << 20):
        raise ValueError(
            f"single-block MLP needs ~{live_bytes >> 20} MiB VMEM; add batch "
            "tiling before running this config on v7x (64 MiB physical VMEM).")
    vmem_limit = int(min(max(2 * live_bytes + (4 << 20), 16 << 20), 48 << 20))

    # TODO(synk): for production batch sizes add a batch-tiled grid with
    # dimension_semantics=("parallel",) (v7x megacore) plus a cross-tile
    # sum / sum-of-squares reduction so BatchNorm statistics stay global over
    # the full batch (naive per-tile stats would change the numerics).

    kernel = _make_mlp_kernel(n_hidden, eps=eps, matmul_dtype=matmul_dtype)
    in_specs = [pl.BlockSpec(memory_space=pltpu.MemorySpace.VMEM) for _ in args]
    out_specs = pl.BlockSpec(memory_space=pltpu.MemorySpace.VMEM)

    out = pl.pallas_call(
        kernel,
        out_shape=jax.ShapeDtypeStruct((batch, out_p), jnp.float32),
        in_specs=in_specs,
        out_specs=out_specs,
        compiler_params=pltpu.CompilerParams(vmem_limit_bytes=vmem_limit),
    )(*args)

    return out[:, :out_dim] if out_p != out_dim else out


def _xavier_uniform(key, fan_in, fan_out):
    limit = jnp.sqrt(6.0 / (fan_in + fan_out))
    return jax.random.uniform(
        key, (fan_in, fan_out), dtype=jnp.float32, minval=-limit, maxval=limit
    )


def init_mlp_params(key, input_size, nrof_layers, nrof_neurons, output_size):
    """Deterministic parameter init mirroring MLPLayer.__init__ shapes."""
    all_input_sizes = [input_size] + [nrof_neurons] * (nrof_layers - 1)
    hidden_params = []
    for i in range(nrof_layers - 1):
        key, kw, kb = jax.random.split(key, 3)
        w = _xavier_uniform(kw, all_input_sizes[i], nrof_neurons)          # (in, out)
        b = 0.01 * jax.random.normal(kb, (1, nrof_neurons), jnp.float32)   # linear bias
        gamma = jnp.ones((1, nrof_neurons), jnp.float32)                   # BN weight
        beta = jnp.zeros((1, nrof_neurons), jnp.float32)                   # BN bias
        hidden_params.append((w, b, gamma, beta))
    key, kw, kb = jax.random.split(key, 3)
    out_w = _xavier_uniform(kw, nrof_neurons, output_size)
    out_b = 0.01 * jax.random.normal(kb, (1, output_size), jnp.float32)
    return hidden_params, out_w, out_b


def mlp_layer_reference(x, hidden_params, out_w, out_b, eps=1e-5):
    """Pure-JAX reference matching the PyTorch module (bias kept, two-pass BN)."""
    h = x
    for (w, b, g, be) in hidden_params:
        h = h @ w + b
        mean = jnp.mean(h, axis=0, keepdims=True)
        var = jnp.mean((h - mean) ** 2, axis=0, keepdims=True)
        h = (h - mean) * jax.lax.rsqrt(var + eps) * g + be
        h = jnp.maximum(h, 0.0)
    return h @ out_w + out_b


if __name__ == "__main__":
    # Small config consistent with the module: MLPLayer(16, 3, 32, 8), batch=8.
    input_size, nrof_layers, nrof_neurons, output_size = 16, 3, 32, 8
    batch = 8

    key = jax.random.PRNGKey(0)
    key, kx = jax.random.split(key)
    x = jax.random.normal(kx, (batch, input_size), dtype=jnp.float32)

    hidden_params, out_w, out_b = init_mlp_params(
        key, input_size, nrof_layers, nrof_neurons, output_size
    )

    ref = mlp_layer_reference(x, hidden_params, out_w, out_b)

    # f32-operand path: tight check vs the PyTorch-faithful reference (the
    # reference keeps the hidden bias; dropping it in-kernel is exact).
    out_f32 = jax.block_until_ready(
        mlp_layer_forward(x, hidden_params, out_w, out_b,
                          matmul_dtype=jnp.float32))
    assert out_f32.shape == (batch, output_size)
    assert jnp.allclose(out_f32, ref, atol=1e-3, rtol=1e-3), "f32 mismatch vs reference"

    # bf16-operand path (production default: ~3x MXU rate, half the weight DMA);
    # loose tolerance for the reduced-precision matmul operands.
    out_bf16 = jax.block_until_ready(
        mlp_layer_forward(x, hidden_params, out_w, out_b,
                          matmul_dtype=jnp.bfloat16))
    assert out_bf16.shape == (batch, output_size)
    assert jnp.allclose(out_bf16, ref, atol=2e-1, rtol=2e-1), "bf16 mismatch vs reference"

    print("KERNEL_OK")
</pallas_src>

<mosaic_0001>
module attributes {stable_mosaic.version = 11 : i64} {
  func.func @kernel(%arg0: memref<8x16xf32, #tpu.memory_space<vmem>>, %arg1: memref<16x128xf32, #tpu.memory_space<vmem>>, %arg2: memref<1x128xf32, #tpu.memory_space<vmem>>, %arg3: memref<1x128xf32, #tpu.memory_space<vmem>>, %arg4: memref<128x128xf32, #tpu.memory_space<vmem>>, %arg5: memref<1x128xf32, #tpu.memory_space<vmem>>, %arg6: memref<1x128xf32, #tpu.memory_space<vmem>>, %arg7: memref<128x128xf32, #tpu.memory_space<vmem>>, %arg8: memref<1x128xf32, #tpu.memory_space<vmem>>, %arg9: memref<8x128xf32, #tpu.memory_space<vmem>>) attributes {dimension_semantics = [], scalar_prefetch = 0 : i64, scratch_operands = 0 : i64, tpu.core_type = #tpu.core_type<tc>} {
    %cst = arith.constant 1.000000e+00 : f32
    %0 = vector.broadcast %cst : f32 to vector<1x8xf32>
    %c0 = arith.constant 0 : index
    %c0_0 = arith.constant 0 : index
    %1 = vector.load %arg0[%c0, %c0_0] : memref<8x16xf32, #tpu.memory_space<vmem>>, vector<8x16xf32>
    %c0_1 = arith.constant 0 : index
    %c0_2 = arith.constant 0 : index
    %2 = vector.load %arg1[%c0_1, %c0_2] : memref<16x128xf32, #tpu.memory_space<vmem>>, vector<16x128xf32>
    %c0_3 = arith.constant 0 : index
    %c0_4 = arith.constant 0 : index
    %3 = vector.load %arg2[%c0_3, %c0_4] : memref<1x128xf32, #tpu.memory_space<vmem>>, vector<1x128xf32>
    %c0_5 = arith.constant 0 : index
    %c0_6 = arith.constant 0 : index
    %4 = vector.load %arg3[%c0_5, %c0_6] : memref<1x128xf32, #tpu.memory_space<vmem>>, vector<1x128xf32>
    %cst_7 = arith.constant dense<0.000000e+00> : vector<8x128xf32>
    %5 = tpu.matmul %1, %2, %cst_7 {dimension_numbers = #tpu.dot_dimension_numbers<[1], [0], [0], [1], [0, 0, 1, 1], [], []>} : vector<8x16xf32>, vector<16x128xf32>, vector<8x128xf32> -> vector<8x128xf32>
    %cst_8 = arith.constant dense<0.000000e+00> : vector<1x128xf32>
    %6 = tpu.matmul %0, %5, %cst_8 {dimension_numbers = #tpu.dot_dimension_numbers<[1], [0], [0], [1], [0, 0, 1, 1], [], []>} : vector<1x8xf32>, vector<8x128xf32>, vector<1x128xf32> -> vector<1x128xf32>
    %7 = arith.mulf %5, %5 : vector<8x128xf32>
    %cst_9 = arith.constant dense<0.000000e+00> : vector<1x128xf32>
    %8 = tpu.matmul %0, %7, %cst_9 {dimension_numbers = #tpu.dot_dimension_numbers<[1], [0], [0], [1], [0, 0, 1, 1], [], []>} : vector<1x8xf32>, vector<8x128xf32>, vector<1x128xf32> -> vector<1x128xf32>
    %cst_10 = arith.constant 1.250000e-01 : f32
    %9 = vector.broadcast %cst_10 : f32 to vector<1x128xf32>
    %10 = arith.mulf %6, %9 : vector<1x128xf32>
    %cst_11 = arith.constant 1.250000e-01 : f32
    %11 = vector.broadcast %cst_11 : f32 to vector<1x128xf32>
    %12 = arith.mulf %8, %11 : vector<1x128xf32>
    %13 = arith.mulf %10, %10 : vector<1x128xf32>
    %14 = arith.subf %12, %13 : vector<1x128xf32>
    %cst_12 = arith.constant 0.000000e+00 : f32
    %15 = vector.broadcast %cst_12 : f32 to vector<1x128xf32>
    %16 = arith.maximumf %14, %15 : vector<1x128xf32>
    %cst_13 = arith.constant 9.99999974E-6 : f32
    %17 = vector.broadcast %cst_13 : f32 to vector<1x128xf32>
    %18 = arith.addf %16, %17 : vector<1x128xf32>
    %19 = math.rsqrt %18 : vector<1x128xf32>
    %20 = arith.mulf %3, %19 : vector<1x128xf32>
    %21 = arith.mulf %10, %20 : vector<1x128xf32>
    %22 = arith.subf %4, %21 : vector<1x128xf32>
    %23 = vector.broadcast %20 : vector<1x128xf32> to vector<8x128xf32>
    %24 = arith.mulf %5, %23 : vector<8x128xf32>
    %25 = vector.broadcast %22 : vector<1x128xf32> to vector<8x128xf32>
    %26 = arith.addf %24, %25 : vector<8x128xf32>
    %cst_14 = arith.constant 0.000000e+00 : f32
    %27 = vector.broadcast %cst_14 : f32 to vector<8x128xf32>
    %28 = arith.maximumf %26, %27 : vector<8x128xf32>
    %c0_15 = arith.constant 0 : index
    %c0_16 = arith.constant 0 : index
    %29 = vector.load %arg4[%c0_15, %c0_16] : memref<128x128xf32, #tpu.memory_space<vmem>>, vector<128x128xf32>
    %c0_17 = arith.constant 0 : index
    %c0_18 = arith.constant 0 : index
    %30 = vector.load %arg5[%c0_17, %c0_18] : memref<1x128xf32, #tpu.memory_space<vmem>>, vector<1x128xf32>
    %c0_19 = arith.constant 0 : index
    %c0_20 = arith.constant 0 : index
    %31 = vector.load %arg6[%c0_19, %c0_20] : memref<1x128xf32, #tpu.memory_space<vmem>>, vector<1x128xf32>
    %cst_21 = arith.constant dense<0.000000e+00> : vector<8x128xf32>
    %32 = tpu.matmul %28, %29, %cst_21 {dimension_numbers = #tpu.dot_dimension_numbers<[1], [0], [0], [1], [0, 0, 1, 1], [], []>} : vector<8x128xf32>, vector<128x128xf32>, vector<8x128xf32> -> vector<8x128xf32>
    %cst_22 = arith.constant dense<0.000000e+00> : vector<1x128xf32>
    %33 = tpu.matmul %0, %32, %cst_22 {dimension_numbers = #tpu.dot_dimension_numbers<[1], [0], [0], [1], [0, 0, 1, 1], [], []>} : vector<1x8xf32>, vector<8x128xf32>, vector<1x128xf32> -> vector<1x128xf32>
    %34 = arith.mulf %32, %32 : vector<8x128xf32>
    %cst_23 = arith.constant dense<0.000000e+00> : vector<1x128xf32>
    %35 = tpu.matmul %0, %34, %cst_23 {dimension_numbers = #tpu.dot_dimension_numbers<[1], [0], [0], [1], [0, 0, 1, 1], [], []>} : vector<1x8xf32>, vector<8x128xf32>, vector<1x128xf32> -> vector<1x128xf32>
    %cst_24 = arith.constant 1.250000e-01 : f32
    %36 = vector.broadcast %cst_24 : f32 to vector<1x128xf32>
    %37 = arith.mulf %33, %36 : vector<1x128xf32>
    %cst_25 = arith.constant 1.250000e-01 : f32
    %38 = vector.broadcast %cst_25 : f32 to vector<1x128xf32>
    %39 = arith.mulf %35, %38 : vector<1x128xf32>
    %40 = arith.mulf %37, %37 : vector<1x128xf32>
    %41 = arith.subf %39, %40 : vector<1x128xf32>
    %cst_26 = arith.constant 0.000000e+00 : f32
    %42 = vector.broadcast %cst_26 : f32 to vector<1x128xf32>
    %43 = arith.maximumf %41, %42 : vector<1x128xf32>
    %cst_27 = arith.constant 9.99999974E-6 : f32
    %44 = vector.broadcast %cst_27 : f32 to vector<1x128xf32>
    %45 = arith.addf %43, %44 : vector<1x128xf32>
    %46 = math.rsqrt %45 : vector<1x128xf32>
    %47 = arith.mulf %30, %46 : vector<1x128xf32>
    %48 = arith.mulf %37, %47 : vector<1x128xf32>
    %49 = arith.subf %31, %48 : vector<1x128xf32>
    %50 = vector.broadcast %47 : vector<1x128xf32> to vector<8x128xf32>
    %51 = arith.mulf %32, %50 : vector<8x128xf32>
    %52 = vector.broadcast %49 : vector<1x128xf32> to vector<8x128xf32>
    %53 = arith.addf %51, %52 : vector<8x128xf32>
    %cst_28 = arith.constant 0.000000e+00 : f32
    %54 = vector.broadcast %cst_28 : f32 to vector<8x128xf32>
    %55 = arith.maximumf %53, %54 : vector<8x128xf32>
    %c0_29 = arith.constant 0 : index
    %c0_30 = arith.constant 0 : index
    %56 = vector.load %arg7[%c0_29, %c0_30] : memref<128x128xf32, #tpu.memory_space<vmem>>, vector<128x128xf32>
    %c0_31 = arith.constant 0 : index
    %c0_32 = arith.constant 0 : index
    %57 = vector.load %arg8[%c0_31, %c0_32] : memref<1x128xf32, #tpu.memory_space<vmem>>, vector<1x128xf32>
    %cst_33 = arith.constant dense<0.000000e+00> : vector<8x128xf32>
    %58 = tpu.matmul %55, %56, %cst_33 {dimension_numbers = #tpu.dot_dimension_numbers<[1], [0], [0], [1], [0, 0, 1, 1], [], []>} : vector<8x128xf32>, vector<128x128xf32>, vector<8x128xf32> -> vector<8x128xf32>
    %59 = vector.broadcast %57 : vector<1x128xf32> to vector<8x128xf32>
    %60 = arith.addf %58, %59 : vector<8x128xf32>
    %c0_34 = arith.constant 0 : index
    %c0_35 = arith.constant 0 : index
    %61 = vector.load %arg9[%c0_34, %c0_35] : memref<8x128xf32, #tpu.memory_space<vmem>>, vector<8x128xf32>
    tpu.vector_store %arg9[%c0_34, %c0_35], %60 {strides = array<i32>} : memref<8x128xf32, #tpu.memory_space<vmem>>, vector<8x128xf32>,
    return
  }
}

</mosaic_0001>

<bundles_post_ra>
// kernel: tpu_custom_call.1
= control target key start
LH: loop header
LB: loop body
LE: loop exit
PB: predicated region body
PF: predicated region fallthrough
CT: control target
= control target key end

     0   :  { %14 = vsyncpa [#allocation3], 0  ;;  %s1147_s0 = inlined_call_operand.hbm [shape: f32[8,16], index: 0, kind: input, shape index: {}]   ;;  %s1148_s1 = inlined_call_operand.hbm [shape: f32[16,128], index: 1, kind: input, shape index: {}]   ;;  %s1149_s2 = inlined_call_operand.vmem [shape: f32[1,128], index: 2, kind: input, shape index: {}]   ;;  %s1150_s3 = inlined_call_operand.vmem [shape: f32[1,128], index: 3, kind: input, shape index: {}]   ;;  %s1151_s4 = inlined_call_operand.hbm [shape: f32[128,128], index: 4, kind: input, shape index: {}]   ;;  %s1152_s5 = inlined_call_operand.vmem [shape: f32[1,128], index: 5, kind: input, shape index: {}]   ;;  %s1153_s6 = inlined_call_operand.vmem [shape: f32[1,128], index: 6, kind: input, shape index: {}]   ;;  %s1154_s7 = inlined_call_operand.hbm [shape: f32[128,128], index: 7, kind: input, shape index: {}]   ;;  %s1155_s8 = inlined_call_operand.vmem [shape: f32[1,128], index: 8, kind: input, shape index: {}]   ;;  %s1156_s9 = inlined_call_operand.hbm [shape: f32[8,128], index: 9, kind: output, shape index: {}]  }
   0x1   :  { %15 = vsyncpa [#allocation6], 0 }
   0x2   :  { %16 = vsyncpa [#allocation9], 0 }
   0x3   :  { %17 = vsyncpa [#allocation4], 0  ;;  %s970_s30 = smov [#allocation5]  }
   0x4   :  { %s33_s10 = sshll.u32 %s970_s30, 4  ;;  %s34_s10 = int_to_ptr.vmem [resolvable:$true] %s33_s10 }
   0x5   :  { %s870_s11 = scalar_lea.vmem %s34_s10, 256  ;;  %p875_p1 = scmp.lt.s32.totalorder %s34_s10, %s34_s10 }
   0x6   :  { %p871_p0 = scmp.ne.s32.totalorder %s34_s10, %s870_s11  ;;  %p876_p2 = scmp.lt.s32.totalorder %s870_s11, %s870_s11 }
   0x8   :  { %p877_p3 = por %p876_p2, %p875_p1 }
   0xa   :  { %p878_p4 = pnand %p877_p3, %p871_p0 }
   0xc   :  { %881 = shalt.err (!%p878_p4)
}
   0xd   :  { %s971_s12 = smov 128   ;;  %s972_s13 = smov 8  }
   0xe   :  { %39 = dma.hbm_to_vmem [thread:$0]  %s1148_s1, 256, %s34_s10, [#allocation6], %s971_s12, %s971_s12, %s972_s13  }
   0xf   :  { %s973_s16 = smov [#allocation2]   ;;  %s974_s18 = smov [#allocation7]  }
  0x10   :  { %s24_s17 = sshll.u32 %s973_s16, 4  ;;  %s49_s19 = sshll.u32 %s974_s18, 4  ;;  %s25_s17 = int_to_ptr.vmem [resolvable:$true] %s24_s17  ;;  %s50_s19 = int_to_ptr.vmem [resolvable:$true] %s49_s19 }
  0x11   :  { %s890_s20 = scalar_lea.vmem %s25_s17, 128  ;;  %p895_p6 = scmp.lt.s32.totalorder %s25_s17, %s25_s17 }
  0x12   :  { %p891_p5 = scmp.ne.s32.totalorder %s25_s17, %s890_s20  ;;  %p896_p7 = scmp.lt.s32.totalorder %s890_s20, %s890_s20 }
  0x14   :  { %p897_p8 = por %p896_p7, %p895_p6 }
  0x16   :  { %p898_p9 = pnand %p897_p8, %p891_p5 }
  0x18   :  { %901 = shalt.err (!%p898_p9)
}
  0x19   :  { %27 = dma.hbm_to_vmem [thread:$0]  %s1147_s0, 128, %s25_s17, [#allocation3]  }
  0x1a   :  { %s910_s23 = scalar_lea.vmem %s50_s19, 2048  ;;  %p915_p11 = scmp.lt.s32.totalorder %s50_s19, %s50_s19 }
  0x1b   :  { %p911_p10 = scmp.ne.s32.totalorder %s50_s19, %s910_s23  ;;  %p916_p12 = scmp.lt.s32.totalorder %s910_s23, %s910_s23 }
  0x1d   :  { %p917_p13 = por %p916_p12, %p915_p11 }
  0x1f   :  { %p918_p0 = pnand %p917_p13, %p911_p10 }
  0x21   :  { %921 = shalt.err (!%p918_p0)
}
  0x22   :  { %55 = dma.hbm_to_vmem [thread:$0]  %s1151_s4, 2048, %s50_s19, [#allocation6], %s971_s12, %s971_s12, %s972_s13  }
  0x23   :  { %s975_s25 = smov [#allocation8]  }
  0x24   :  { %s65_s26 = sshll.u32 %s975_s25, 4  ;;  %s66_s26 = int_to_ptr.vmem [resolvable:$true] %s65_s26 }
  0x25   :  { %s930_s27 = scalar_lea.vmem %s66_s26, 2048  ;;  %p935_p2 = scmp.lt.s32.totalorder %s66_s26, %s66_s26 }
  0x26   :  { %p931_p1 = scmp.ne.s32.totalorder %s66_s26, %s930_s27  ;;  %p936_p3 = scmp.lt.s32.totalorder %s930_s27, %s930_s27 }
  0x28   :  { %p937_p4 = por %p936_p3, %p935_p2 }
  0x2a   :  { %p938_p5 = pnand %p937_p4, %p931_p1 }
  0x2c   :  { %941 = shalt.err (!%p938_p5)
}
  0x2d   :  { %71 = dma.hbm_to_vmem [thread:$0]  %s1154_s7, 2048, %s66_s26, [#allocation9], %s971_s12, %s971_s12, %s972_s13  }
  0x2e   :  { %962 = dma.done.wait [#allocation3], 128  }
  0x2f   :  { %963 = vsyncadd [#allocation3], 4294967168 }
  0x30   :  { %964 = dma.done.wait [#allocation6], 2304  }
  0x31   :  { %965 = vsyncadd [#allocation6], 4294964992 }
  0x32   :  { %966 = dma.done.wait [#allocation9], 2048  }
  0x33   :  { %967 = vsyncadd [#allocation9], 4294965248  ;;  %v976_v0 = vmov 0.0   ;;  %vm977_vm0 = vmmov 0   ;;  %v88_v1 = vld [vmem:[#allocation5 + $0x8] sm:$0xff]  ;;  %v87_v2 = vld [vmem:[#allocation5] sm:$0xff]  ;;  %v321_v34 = vlaneseq }
  0x34   :  { %751 = vmatprep.subr.mxu0 %v976_v0  ;;  %755 = vmatprep.mubr.msk.f32.mxu0 %vm977_vm0, %v976_v0  ;;  %v86_v3 = vld [vmem:[#allocation2] sm:$0xff]  ;;  %vm91_vm1 = vcmask 130048   ;;  %vm165_vm2 = vcmask 64512   ;;  %v978_v7 = vmov 1.0   ;;  %v350_v8 = vld [vmem:[#allocation7 + $0x78] sm:$0xff]  ;;  %v349_v9 = vld [vmem:[#allocation7 + $0x70] sm:$0xff] }
  0x35   :  { %763 = vmatprep.subr.mxu1 %v976_v0  ;;  %765 = vmatprep.mubr.msk.f32.mxu1 %vm977_vm0, %v976_v0  ;;  %v348_v10 = vld [vmem:[#allocation7 + $0x68] sm:$0xff]  ;;  %v347_v11 = vld [vmem:[#allocation7 + $0x60] sm:$0xff]  ;;  %v346_v12 = vld [vmem:[#allocation7 + $0x58] sm:$0xff]  ;;  %v322_v35 = vshrl.u32 %v321_v34, 7 }
  0x36   :  { %752 = vmatpush3.msra.mxu0 %v88_v1  ;;  %v345_v13 = vld [vmem:[#allocation7 + $0x50] sm:$0xff]  ;;  %v344_v14 = vld [vmem:[#allocation7 + $0x48] sm:$0xff]  ;;  %v343_v15 = vld [vmem:[#allocation7 + $0x40] sm:$0xff] }
  0x37   :  { %753 = vmatprep.subr.mxu0 %v976_v0  ;;  %v342_v16 = vld [vmem:[#allocation7 + $0x38] sm:$0xff]  ;;  %v341_v17 = vld [vmem:[#allocation7 + $0x30] sm:$0xff]  ;;  %v340_v18 = vld [vmem:[#allocation7 + $0x28] sm:$0xff]  ;;  %v1094_v37 = vsub.s32 0, %v322_v35 }
  0x38   :  { %754 = vmatpush3.msra.mxu0 %v87_v2  ;;  %v339_v19 = vld [vmem:[#allocation7 + $0x20] sm:$0xff]  ;;  %v338_v20 = vld [vmem:[#allocation7 + $0x18] sm:$0xff]  ;;  %v337_v21 = vld [vmem:[#allocation7 + $0x10] sm:$0xff] }
  0x39   :  { %756 = vmatmul.mubr.msk.f32.vlgmr.msra.gmra.mxu0 %vm91_vm1, %v86_v3  ;;  %758 = vmatprep.subr.mxu0 %v976_v0  ;;  %v336_v22 = vld [vmem:[#allocation7 + $0x8] sm:$0xff]  ;;  %v335_v23 = vld [vmem:[#allocation7] sm:$0xff]  ;;  %v604_v51 = vld [vmem:[#allocation8 + $0x78] sm:$0xff] }
  0x3a   :  { %760 = vmatprep.mubr.msk.f32.mxu0 %vm977_vm0, %v976_v0  ;;  %v89_v36 = vld [vmem:[%s1149_s2] sm:$0x1]  ;;  %v603_v52 = vld [vmem:[#allocation8 + $0x70] sm:$0xff]  ;;  %v601_v54 = vld [vmem:[#allocation8 + $0x60] sm:$0xff] }
  0x3b   :  { %v90_v40 = vld [vmem:[%s1150_s3] sm:$0x1]  ;;  %v600_v55 = vld [vmem:[#allocation8 + $0x58] sm:$0xff]  ;;  %v599_v56 = vld [vmem:[#allocation8 + $0x50] sm:$0xff] }
  0x3c   :  { %v602_v53 = vld [vmem:[#allocation8 + $0x68] sm:$0xff]  ;;  %v597_v58 = vld [vmem:[#allocation8 + $0x40] sm:$0xff]  ;;  %v596_v59 = vld [vmem:[#allocation8 + $0x38] sm:$0xff] }
  0x3d   :  { %v598_v57 = vld [vmem:[#allocation8 + $0x48] sm:$0xff]  ;;  %v595_v60 = vld [vmem:[#allocation8 + $0x30] sm:$0xff]  ;;  %v593_v62 = vld [vmem:[#allocation8 + $0x20] sm:$0xff] }
  0x3e   :  { %v594_v61 = vld [vmem:[#allocation8 + $0x28] sm:$0xff]  ;;  %v592_v63 = vld [vmem:[#allocation8 + $0x18] sm:$0xff]  ;;  %v591_v1 = vld [vmem:[#allocation8 + $0x10] sm:$0xff] }
  0x3f   :  { %v590_v2 = vld [vmem:[#allocation8 + $0x8] sm:$0xff]  ;;  %v589_v3 = vld [vmem:[#allocation8] sm:$0xff] }
  0xf9   :  { %v1061_v4 = vpop.f32.mrf.mxu0 }
  0xfa   :  { %759 = vmatpush3.msra.mxu0 %v1061_v4  ;;  %v239_v5 = vmul.f32 %v1061_v4, %v1061_v4 }
  0xfb   :  { %v757_v6 = vpop.f32.mrf.mxu0  ;;  %761 = vmatmul.mubr.msk.f32.vlgmr.msra.gmra.mxu0 %vm165_vm2, %v978_v7  ;;  %768 = vmatprep.subr.mxu0 %v976_v0 }
  0xfc   :  { %764 = vmatpush3.msra.mxu1 %v239_v5  ;;  %800 = vmatprep.mubr.msk.f32.mxu0 %vm977_vm0, %v976_v0 }
  0xfd   :  { %766 = vmatmul.mubr.msk.f32.vlgmr.msra.gmra.mxu1 %vm165_vm2, %v978_v7  ;;  %803 = vmatprep.subr.mxu1 %v976_v0 }
  0xfe   :  { %805 = vmatprep.mubr.msk.f32.mxu1 %vm977_vm0, %v976_v0  ;;  %769 = vmatpush3.msra.mxu0 %v350_v8 }
  0xff   :  { %770 = vmatprep.subr.mxu0 %v976_v0 }
 0x100   :  { %771 = vmatpush3.msra.mxu0 %v349_v9 }
 0x101   :  { %772 = vmatprep.subr.mxu0 %v976_v0 }
 0x102   :  { %773 = vmatpush3.msra.mxu0 %v348_v10 }
 0x103   :  { %774 = vmatprep.subr.mxu0 %v976_v0 }
 0x104   :  { %775 = vmatpush3.msra.mxu0 %v347_v11 }
 0x105   :  { %776 = vmatprep.subr.mxu0 %v976_v0 }
 0x106   :  { %777 = vmatpush3.msra.mxu0 %v346_v12 }
 0x107   :  { %778 = vmatprep.subr.mxu0 %v976_v0 }
 0x108   :  { %779 = vmatpush3.msra.mxu0 %v345_v13 }
 0x109   :  { %780 = vmatprep.subr.mxu0 %v976_v0 }
 0x10a   :  { %781 = vmatpush3.msra.mxu0 %v344_v14  ;;  %v351_v14 = vld [vmem:[%s1152_s5] sm:$0x1]  ;;  %s979_s5 = smov [#allocation10]  }
 0x10b   :  { %782 = vmatprep.subr.mxu0 %v976_v0  ;;  %s689_s14 = sshll.u32 %s979_s5, 4  ;;  %s690_s14 = int_to_ptr.vmem [resolvable:$true] %s689_s14 }
 0x10c   :  { %783 = vmatpush3.msra.mxu0 %v343_v15  ;;  %p947_p7 = scmp.lt.s32.totalorder %s690_s14, %s690_s14 }
 0x10d   :  { %784 = vmatprep.subr.mxu0 %v976_v0 }
 0x10e   :  { %785 = vmatpush3.msra.mxu0 %v342_v16 }
 0x10f   :  { %786 = vmatprep.subr.mxu0 %v976_v0 }
 0x110   :  { %787 = vmatpush3.msra.mxu0 %v341_v17 }
 0x111   :  { %788 = vmatprep.subr.mxu0 %v976_v0 }
 0x112   :  { %789 = vmatpush3.msra.mxu0 %v340_v18 }
 0x113   :  { %790 = vmatprep.subr.mxu0 %v976_v0 }
 0x114   :  { %791 = vmatpush3.msra.mxu0 %v339_v19 }
 0x115   :  { %792 = vmatprep.subr.mxu0 %v976_v0 }
 0x116   :  { %793 = vmatpush3.msra.mxu0 %v338_v20 }
 0x117   :  { %794 = vmatprep.subr.mxu0 %v976_v0 }
 0x118   :  { %795 = vmatpush3.msra.mxu0 %v337_v21 }
 0x119   :  { %796 = vmatprep.subr.mxu0 %v976_v0 }
 0x11a   :  { %797 = vmatpush3.msra.mxu0 %v336_v22 }
 0x11b   :  { %798 = vmatprep.subr.mxu0 %v976_v0 }
 0x11c   :  { %799 = vmatpush3.msra.mxu0 %v335_v23 }
 0x1bb   :  { %v235_v24 = vpop.f32.mrf.mxu0 }
 0x1bc   :  { %v310_v25 = vmul.f32 0.125, %v235_v24  ;;  %v705_v24 = vld [vmem:[%s1155_s8] ss:$0 sm:$0xff] }
 0x1bd   :  { %v762_v26 = vpop.f32.mrf.mxu0  ;;  %v306_v27 = vpop.f32.mrf.mxu1 }
 0x1be   :  { %v312_v28 = vmul.f32 %v310_v25, %v310_v25  ;;  %v311_v29 = vmul.f32 0.125, %v306_v27 }
 0x1bf   :  { %v767_v30 = vpop.f32.mrf.mxu1 }
 0x1c0   :  { %v313_v31 = vsub.f32 %v311_v29, %v312_v28 }
 0x1c2   :  { %v314_v32 = vmax.f32 %v313_v31, 0.0 }
 0x1c4   :  { %v315_v33 = vadd.f32 1e-05, %v314_v32 }
 0x1c6   :  { %858 = vrsqrt.f32 %v315_v33 }
 0x1d3   :  { %v859_v38 = vpop.eup %858 }
 0x1d4   :  { %v317_v39 = vmul.f32 %v859_v38, %v89_v36 }
 0x1d6   :  { %v318_v41 = vmul.f32 %v317_v39, %v310_v25  ;;  %v324_v42 = vrot.slane %v317_v39, %v1094_v37 }
 0x1d8   :  { %v319_v43 = vsub.f32 %v90_v40, %v318_v41  ;;  %v326_v44 = vmul.f32 %v324_v42, %v1061_v4 }
 0x1da   :  { %v331_v45 = vrot.slane %v319_v43, %v1094_v37 }
 0x1dc   :  { %v333_v46 = vadd.f32 %v331_v45, %v326_v44 }
 0x1de   :  { %v334_v47 = vmax.f32 %v333_v46, 0.0 }
 0x1e0   :  { %801 = vmatmul.mubr.f32.vlgmr.msra.gmra.mxu0 %v334_v47 }
 0x2a0   :  { %v1102_v48 = vpop.f32.mrf.mxu0 }
 0x2a1   :  { %v493_v49 = vmul.f32 %v1102_v48, %v1102_v48  ;;  %804 = vmatpush3.msra.mxu1 %v1102_v48 }
 0x2a2   :  { %v802_v50 = vpop.f32.mrf.mxu0  ;;  %806 = vmatmul.mubr.msk.f32.vlgmr.msra.gmra.mxu1 %vm165_vm2, %v978_v7  ;;  %808 = vmatprep.subr.mxu1 %v976_v0 }
 0x2a3   :  { %809 = vmatpush3.msra.mxu1 %v493_v49  ;;  %810 = vmatprep.mubr.msk.f32.mxu1 %vm977_vm0, %v976_v0 }
 0x2a4   :  { %813 = vmatprep.subr.mxu1 %v976_v0 }
 0x2a6   :  { %811 = vmatmul.mubr.msk.f32.vlgmr.msra.gmra.mxu1 %vm165_vm2, %v978_v7 }
 0x2a7   :  { %845 = vmatprep.mubr.msk.f32.mxu1 %vm977_vm0, %v976_v0  ;;  %814 = vmatpush3.msra.mxu1 %v604_v51 }
 0x2a8   :  { %815 = vmatprep.subr.mxu1 %v976_v0 }
 0x2a9   :  { %816 = vmatpush3.msra.mxu1 %v603_v52 }
 0x2aa   :  { %817 = vmatprep.subr.mxu1 %v976_v0 }
 0x2ab   :  { %818 = vmatpush3.msra.mxu1 %v602_v53 }
 0x2ac   :  { %819 = vmatprep.subr.mxu1 %v976_v0 }
 0x2ad   :  { %820 = vmatpush3.msra.mxu1 %v601_v54 }
 0x2ae   :  { %821 = vmatprep.subr.mxu1 %v976_v0 }
 0x2af   :  { %822 = vmatpush3.msra.mxu1 %v600_v55 }
 0x2b0   :  { %823 = vmatprep.subr.mxu1 %v976_v0 }
 0x2b1   :  { %824 = vmatpush3.msra.mxu1 %v599_v56 }
 0x2b2   :  { %825 = vmatprep.subr.mxu1 %v976_v0 }
 0x2b3   :  { %826 = vmatpush3.msra.mxu1 %v598_v57 }
 0x2b4   :  { %827 = vmatprep.subr.mxu1 %v976_v0 }
 0x2b5   :  { %828 = vmatpush3.msra.mxu1 %v597_v58 }
 0x2b6   :  { %829 = vmatprep.subr.mxu1 %v976_v0 }
 0x2b7   :  { %830 = vmatpush3.msra.mxu1 %v596_v59 }
 0x2b8   :  { %831 = vmatprep.subr.mxu1 %v976_v0 }
 0x2b9   :  { %832 = vmatpush3.msra.mxu1 %v595_v60 }
 0x2ba   :  { %833 = vmatprep.subr.mxu1 %v976_v0 }
 0x2bb   :  { %834 = vmatpush3.msra.mxu1 %v594_v61 }
 0x2bc   :  { %835 = vmatprep.subr.mxu1 %v976_v0 }
 0x2bd   :  { %836 = vmatpush3.msra.mxu1 %v593_v62 }
 0x2be   :  { %837 = vmatprep.subr.mxu1 %v976_v0 }
 0x2bf   :  { %838 = vmatpush3.msra.mxu1 %v592_v63 }
 0x2c0   :  { %839 = vmatprep.subr.mxu1 %v976_v0 }
 0x2c1   :  { %840 = vmatpush3.msra.mxu1 %v591_v1 }
 0x2c2   :  { %841 = vmatprep.subr.mxu1 %v976_v0 }
 0x2c3   :  { %842 = vmatpush3.msra.mxu1 %v590_v2 }
 0x2c4   :  { %843 = vmatprep.subr.mxu1 %v976_v0  ;;  %v352_v0 = vld [vmem:[%s1153_s6] sm:$0x1]  ;;  %s942_s6 = scalar_lea.vmem %s690_s14, 128 }
 0x2c5   :  { %844 = vmatpush3.msra.mxu1 %v589_v3  ;;  %p943_p6 = scmp.ne.s32.totalorder %s690_s14, %s942_s6  ;;  %p948_p8 = scmp.lt.s32.totalorder %s942_s6, %s942_s6 }
 0x2c7   :  { %p949_p9 = por %p948_p8, %p947_p7 }
 0x2c9   :  { %p950_p10 = pnand %p949_p9, %p943_p6 }
 0x362   :  { %v489_v4 = vpop.f32.mrf.mxu1 }
 0x363   :  { %v564_v5 = vmul.f32 0.125, %v489_v4 }
 0x364   :  { %v807_v6 = vpop.f32.mrf.mxu1 }
 0x365   :  { %v566_v8 = vmul.f32 %v564_v5, %v564_v5 }
 0x366   :  { %v560_v7 = vpop.f32.mrf.mxu1 }
 0x367   :  { %v565_v9 = vmul.f32 0.125, %v560_v7 }
 0x368   :  { %v812_v10 = vpop.f32.mrf.mxu1 }
 0x369   :  { %v567_v11 = vsub.f32 %v565_v9, %v566_v8 }
 0x36b   :  { %v568_v12 = vmax.f32 %v567_v11, 0.0 }
 0x36d   :  { %v569_v13 = vadd.f32 1e-05, %v568_v12 }
 0x36f   :  { %860 = vrsqrt.f32 %v569_v13 }
 0x37c   :  { %v861_v15 = vpop.eup %860 }
 0x37d   :  { %v571_v16 = vmul.f32 %v861_v15, %v351_v14 }
 0x37f   :  { %v572_v17 = vmul.f32 %v571_v16, %v564_v5  ;;  %v578_v18 = vrot.slane %v571_v16, %v1094_v37 }
 0x381   :  { %v573_v19 = vsub.f32 %v352_v0, %v572_v17  ;;  %v580_v20 = vmul.f32 %v578_v18, %v1102_v48 }
 0x383   :  { %v585_v21 = vrot.slane %v573_v19, %v1094_v37 }
 0x385   :  { %v587_v22 = vadd.f32 %v585_v21, %v580_v20 }
 0x387   :  { %v588_v23 = vmax.f32 %v587_v22, 0.0 }
 0x389   :  { %846 = vmatmul.mubr.f32.vlgmr.msra.gmra.mxu1 %v588_v23 }
 0x449   :  { %v678_v25 = vpop.f32.mrf.mxu1 }
 0x44a   :  { %v679_v26 = vadd.f32 %v705_v24, %v678_v25 }
 0x44b   :  { %v847_v27 = vpop.f32.mrf.mxu1 }
 0x44c   :  { %682 = vst [vmem:[#allocation10] sm:$0xff] %v679_v26 }
 0x44d   :  { %953 = shalt.err (!%p950_p10)
}
 0x44e   :  { %692 = dma.vmem_to_hbm [thread:$0]  %s690_s14, 128, %s1156_s9, [#allocation4]  }
 0x44f   :  { %968 = dma.done.wait [#allocation4], 128  }
 0x450   :  { %969 = vsyncadd [#allocation4], 4294967168 }
 0x451   :  { %696 = vsyncpa [#allocation3], 1 }
 0x452   :  { %697 = vsyncpa [#allocation6], 1 }
 0x453   :  { %698 = vsyncpa [#allocation9], 1 }
 0x454   :  { %699 = vsyncpa [#allocation4], 1 }

</bundles_post_ra>
